<compile_context>
chip_gen: v7x
topology: tpu7x:2x2x1
jax: 0.10.0
libtpu: 0.0.40
codegen_flags: <defaults>
</compile_context>

<pallas_src>
import jax
import jax.numpy as jnp
from jax.experimental import pallas as pl
from jax.experimental.pallas import tpu as pltpu

LANE = 128
SUBLANE = 8


def _round_up(n, m):
    return ((n + m - 1) // m) * m


# ----------------------------- Fused Pallas kernel -------------------------

def _make_vae_kernel(n_enc, n_dec, latent_pad):
    """Build the fused forward kernel for n_enc encoder and n_dec decoder layers.

    Ref order: x, eps, [W,b]*n_enc, W_mulogvar, b_mulogvar, [W,b]*n_dec,
               W_out, b_out, recon_out, mu_out, logvar_out.
    """

    def kernel(*refs):
        idx = 0
        x_ref = refs[idx]; idx += 1
        eps_ref = refs[idx]; idx += 1
        enc = [(refs[idx + 2 * i], refs[idx + 2 * i + 1]) for i in range(n_enc)]
        idx += 2 * n_enc
        w_ml, b_ml = refs[idx], refs[idx + 1]; idx += 2
        dec = [(refs[idx + 2 * i], refs[idx + 2 * i + 1]) for i in range(n_dec)]
        idx += 2 * n_dec
        w_out, b_out = refs[idx], refs[idx + 1]; idx += 2
        recon_ref, mu_ref, logvar_ref = refs[idx], refs[idx + 1], refs[idx + 2]

        # ---- encoder: Linear + ReLU stack (all resident in VMEM/vregs) ----
        h = x_ref[...]
        for w, b in enc:
            h = jnp.dot(h, w[...], preferred_element_type=jnp.float32) + b[...]
            h = jnp.maximum(h, 0.0)

        # ---- mu / logvar in a single concatenated matmul ----
        ml = jnp.dot(h, w_ml[...], preferred_element_type=jnp.float32) + b_ml[...]
        mu = ml[:, :latent_pad]          # tile-aligned slice (128-lane boundary)
        logvar = ml[:, latent_pad:]

        # ---- reparameterize: z = eps * exp(0.5*logvar) + mu ----
        z = eps_ref[...] * jnp.exp(0.5 * logvar) + mu

        # ---- decoder: Linear + ReLU stack, then Linear + Sigmoid ----
        d = z
        for w, b in dec:
            d = jnp.dot(d, w[...], preferred_element_type=jnp.float32) + b[...]
            d = jnp.maximum(d, 0.0)
        y = jnp.dot(d, w_out[...], preferred_element_type=jnp.float32) + b_out[...]
        # sigmoid via EUP: exp + approx reciprocal (separate bundle slots)
        recon = pl.reciprocal(1.0 + jnp.exp(-y), approx=True)
        recon = jnp.clip(recon, 0.0, 1.0)

        recon_ref[...] = recon.astype(recon_ref.dtype)
        mu_ref[...] = mu.astype(mu_ref.dtype)
        logvar_ref[...] = logvar.astype(logvar_ref.dtype)

    return kernel


_VMEM_SPEC = pl.BlockSpec(memory_space=pltpu.MemorySpace.VMEM)


def vae_forward(params, x, eps):
    """Matches VAE.forward semantics: returns (recon, mu, logvar).

    x:   [batch, input_size] (or anything that flattens to it)
    eps: [batch, latent_size] standard-normal sample (torch.randn_like eps)
    """
    dims = params["dims"]
    batch = x.shape[0]
    x2 = x.reshape(batch, -1).astype(jnp.float32)
    assert x2.shape[1] == dims["input_size"]

    bp = _round_up(max(batch, SUBLANE), SUBLANE)
    din_p = dims["input_pad"]
    lat_p = dims["latent_pad"]

    # Zero-pad batch/feature dims once on the way in (lane/sublane dense).
    x_pad = jnp.zeros((bp, din_p), jnp.float32).at[:batch, :x2.shape[1]].set(x2)
    eps_pad = jnp.zeros((bp, lat_p), jnp.float32).at[
        :batch, :dims["latent_size"]].set(eps.astype(jnp.float32))

    flat_inputs = [x_pad, eps_pad]
    for w, b in params["enc"]:
        flat_inputs += [w, b]
    flat_inputs += [params["mlv"][0], params["mlv"][1]]
    for w, b in params["dec"]:
        flat_inputs += [w, b]
    flat_inputs += [params["out"][0], params["out"][1]]

    kernel = _make_vae_kernel(len(params["enc"]), len(params["dec"]), lat_p)

    recon_p, mu_p, logvar_p = pl.pallas_call(
        kernel,
        out_shape=(
            jax.ShapeDtypeStruct((bp, din_p), jnp.float32),
            jax.ShapeDtypeStruct((bp, lat_p), jnp.float32),
            jax.ShapeDtypeStruct((bp, lat_p), jnp.float32),
        ),
        in_specs=[_VMEM_SPEC] * len(flat_inputs),
        out_specs=(_VMEM_SPEC, _VMEM_SPEC, _VMEM_SPEC),
    )(*flat_inputs)

    recon = recon_p[:batch, :dims["input_size"]]
    mu = mu_p[:batch, :dims["latent_size"]]
    logvar = logvar_p[:batch, :dims["latent_size"]]
    return recon, mu, logvar


# ------------------------------ Parameter init -----------------------------

def _init_linear_padded(key, in_dim, out_dim, in_pad, out_pad, dtype=jnp.float32):
    """PyTorch-default-like uniform(-1/sqrt(in), 1/sqrt(in)), zero-padded to
    [in_pad, out_pad] so padded lanes/rows are mathematically inert."""
    kw, kb = jax.random.split(key)
    bound = 1.0 / float(in_dim) ** 0.5
    w = jax.random.uniform(kw, (in_dim, out_dim), dtype, -bound, bound)
    b = jax.random.uniform(kb, (out_dim,), dtype, -bound, bound)
    w_pad = jnp.zeros((in_pad, out_pad), dtype).at[:in_dim, :out_dim].set(w)
    b_pad = jnp.zeros((1, out_pad), dtype).at[0, :out_dim].set(b)
    return w_pad, b_pad


def init_vae_params(key, input_size, encoder_hidden_sizes, latent_size,
                    decoder_hidden_sizes, dtype=jnp.float32):
    assert len(encoder_hidden_sizes) > 0
    assert len(decoder_hidden_sizes) > 0

    input_pad = _round_up(input_size, LANE)
    latent_pad = _round_up(latent_size, LANE)

    params = {"enc": [], "dec": []}

    prev, prev_pad = input_size, input_pad
    for h in encoder_hidden_sizes:
        h_pad = _round_up(h, LANE)
        key, sub = jax.random.split(key)
        params["enc"].append(_init_linear_padded(sub, prev, h, prev_pad, h_pad, dtype))
        prev, prev_pad = h, h_pad

    # hidden2mean ++ hidden2logvar fused into one [H_pad, 2*latent_pad] weight.
    key, k_mu, k_lv = jax.random.split(key, 3)
    w_mu, b_mu = _init_linear_padded(k_mu, prev, latent_size, prev_pad, latent_pad, dtype)
    w_lv, b_lv = _init_linear_padded(k_lv, prev, latent_size, prev_pad, latent_pad, dtype)
    params["mlv"] = (jnp.concatenate([w_mu, w_lv], axis=1),
                     jnp.concatenate([b_mu, b_lv], axis=1))

    prev, prev_pad = latent_size, latent_pad
    for h in decoder_hidden_sizes:
        h_pad = _round_up(h, LANE)
        key, sub = jax.random.split(key)
        params["dec"].append(_init_linear_padded(sub, prev, h, prev_pad, h_pad, dtype))
        prev, prev_pad = h, h_pad

    key, sub = jax.random.split(key)
    params["out"] = _init_linear_padded(sub, prev, input_size, prev_pad, input_pad, dtype)

    params["dims"] = {
        "input_size": input_size,
        "latent_size": latent_size,
        "input_pad": input_pad,
        "latent_pad": latent_pad,
        "enc_sizes": list(encoder_hidden_sizes),
        "dec_sizes": list(decoder_hidden_sizes),
    }
    return params


# ------------------------- Pure-JAX reference (check) -----------------------

def vae_reference(params, x, eps):
    """Unpadded pure-JAX forward built by slicing the padded params."""
    dims = params["dims"]
    batch = x.shape[0]
    h = x.reshape(batch, -1).astype(jnp.float32)

    prev = dims["input_size"]
    for (w, b), hs in zip(params["enc"], dims["enc_sizes"]):
        h = jnp.maximum(h @ w[:prev, :hs] + b[0, :hs], 0.0)
        prev = hs

    lat, lat_p = dims["latent_size"], dims["latent_pad"]
    w_ml, b_ml = params["mlv"]
    mu = h @ w_ml[:prev, :lat] + b_ml[0, :lat]
    logvar = h @ w_ml[:prev, lat_p:lat_p + lat] + b_ml[0, lat_p:lat_p + lat]
    z = eps * jnp.exp(0.5 * logvar) + mu

    d = z
    prev = lat
    for (w, b), hs in zip(params["dec"], dims["dec_sizes"]):
        d = jnp.maximum(d @ w[:prev, :hs] + b[0, :hs], 0.0)
        prev = hs
    w_o, b_o = params["out"]
    y = d @ w_o[:prev, :dims["input_size"]] + b_o[0, :dims["input_size"]]
    return jax.nn.sigmoid(y), mu, logvar


# --------------------------------- Main -------------------------------------

if __name__ == "__main__":
    input_size = 32
    encoder_hidden_sizes = [64, 48]
    latent_size = 16
    decoder_hidden_sizes = [48, 64]
    batch = 8

    root = jax.random.PRNGKey(0)
    k_params, k_x, k_eps = jax.random.split(root, 3)

    params = init_vae_params(k_params, input_size, encoder_hidden_sizes,
                             latent_size, decoder_hidden_sizes)
    x = jax.random.uniform(k_x, (batch, input_size), jnp.float32)
    eps = jax.random.normal(k_eps, (batch, latent_size), jnp.float32)

    recon, mu, logvar = vae_forward(params, x, eps)
    jax.block_until_ready((recon, mu, logvar))

    # Shape / range sanity.
    assert recon.shape == (batch, input_size)
    assert mu.shape == (batch, latent_size)
    assert logvar.shape == (batch, latent_size)
    assert bool(jnp.all(jnp.isfinite(recon)))
    assert bool(jnp.all(recon >= 0.0)) and bool(jnp.all(recon <= 1.0))

    # Numerical check against an unpadded pure-JAX reference (same eps).
    recon_ref, mu_ref, logvar_ref = vae_reference(params, x, eps)
    assert bool(jnp.allclose(mu, mu_ref, atol=5e-2, rtol=5e-2))
    assert bool(jnp.allclose(logvar, logvar_ref, atol=5e-2, rtol=5e-2))
    assert bool(jnp.allclose(recon, recon_ref, atol=5e-2, rtol=5e-2))

    print("KERNEL_OK")
</pallas_src>

<mosaic_0001>
module attributes {stable_mosaic.version = 11 : i64} {
  func.func @kernel(%arg0: memref<8x128xf32, #tpu.memory_space<vmem>>, %arg1: memref<8x128xf32, #tpu.memory_space<vmem>>, %arg2: memref<128x128xf32, #tpu.memory_space<vmem>>, %arg3: memref<1x128xf32, #tpu.memory_space<vmem>>, %arg4: memref<128x128xf32, #tpu.memory_space<vmem>>, %arg5: memref<1x128xf32, #tpu.memory_space<vmem>>, %arg6: memref<128x256xf32, #tpu.memory_space<vmem>>, %arg7: memref<1x256xf32, #tpu.memory_space<vmem>>, %arg8: memref<128x128xf32, #tpu.memory_space<vmem>>, %arg9: memref<1x128xf32, #tpu.memory_space<vmem>>, %arg10: memref<128x128xf32, #tpu.memory_space<vmem>>, %arg11: memref<1x128xf32, #tpu.memory_space<vmem>>, %arg12: memref<128x128xf32, #tpu.memory_space<vmem>>, %arg13: memref<1x128xf32, #tpu.memory_space<vmem>>, %arg14: memref<8x128xf32, #tpu.memory_space<vmem>>, %arg15: memref<8x128xf32, #tpu.memory_space<vmem>>, %arg16: memref<8x128xf32, #tpu.memory_space<vmem>>) attributes {dimension_semantics = [], scalar_prefetch = 0 : i64, scratch_operands = 0 : i64, tpu.core_type = #tpu.core_type<tc>} {
    %c0 = arith.constant 0 : index
    %c0_0 = arith.constant 0 : index
    %0 = vector.load %arg0[%c0, %c0_0] : memref<8x128xf32, #tpu.memory_space<vmem>>, vector<8x128xf32>
    %c0_1 = arith.constant 0 : index
    %c0_2 = arith.constant 0 : index
    %1 = vector.load %arg2[%c0_1, %c0_2] : memref<128x128xf32, #tpu.memory_space<vmem>>, vector<128x128xf32>
    %cst = arith.constant dense<0.000000e+00> : vector<8x128xf32>
    %2 = tpu.matmul %0, %1, %cst {dimension_numbers = #tpu.dot_dimension_numbers<[1], [0], [0], [1], [0, 0, 1, 1], [], []>} : vector<8x128xf32>, vector<128x128xf32>, vector<8x128xf32> -> vector<8x128xf32>
    %c0_3 = arith.constant 0 : index
    %c0_4 = arith.constant 0 : index
    %3 = vector.load %arg3[%c0_3, %c0_4] : memref<1x128xf32, #tpu.memory_space<vmem>>, vector<1x128xf32>
    %4 = vector.broadcast %3 : vector<1x128xf32> to vector<8x128xf32>
    %5 = arith.addf %2, %4 : vector<8x128xf32>
    %cst_5 = arith.constant 0.000000e+00 : f32
    %6 = vector.broadcast %cst_5 : f32 to vector<8x128xf32>
    %7 = arith.maximumf %5, %6 : vector<8x128xf32>
    %c0_6 = arith.constant 0 : index
    %c0_7 = arith.constant 0 : index
    %8 = vector.load %arg4[%c0_6, %c0_7] : memref<128x128xf32, #tpu.memory_space<vmem>>, vector<128x128xf32>
    %cst_8 = arith.constant dense<0.000000e+00> : vector<8x128xf32>
    %9 = tpu.matmul %7, %8, %cst_8 {dimension_numbers = #tpu.dot_dimension_numbers<[1], [0], [0], [1], [0, 0, 1, 1], [], []>} : vector<8x128xf32>, vector<128x128xf32>, vector<8x128xf32> -> vector<8x128xf32>
    %c0_9 = arith.constant 0 : index
    %c0_10 = arith.constant 0 : index
    %10 = vector.load %arg5[%c0_9, %c0_10] : memref<1x128xf32, #tpu.memory_space<vmem>>, vector<1x128xf32>
    %11 = vector.broadcast %10 : vector<1x128xf32> to vector<8x128xf32>
    %12 = arith.addf %9, %11 : vector<8x128xf32>
    %cst_11 = arith.constant 0.000000e+00 : f32
    %13 = vector.broadcast %cst_11 : f32 to vector<8x128xf32>
    %14 = arith.maximumf %12, %13 : vector<8x128xf32>
    %c0_12 = arith.constant 0 : index
    %c0_13 = arith.constant 0 : index
    %15 = vector.load %arg6[%c0_12, %c0_13] : memref<128x256xf32, #tpu.memory_space<vmem>>, vector<128x256xf32>
    %cst_14 = arith.constant dense<0.000000e+00> : vector<8x256xf32>
    %16 = tpu.matmul %14, %15, %cst_14 {dimension_numbers = #tpu.dot_dimension_numbers<[1], [0], [0], [1], [0, 0, 1, 1], [], []>} : vector<8x128xf32>, vector<128x256xf32>, vector<8x256xf32> -> vector<8x256xf32>
    %c0_15 = arith.constant 0 : index
    %c0_16 = arith.constant 0 : index
    %17 = vector.load %arg7[%c0_15, %c0_16] : memref<1x256xf32, #tpu.memory_space<vmem>>, vector<1x256xf32>
    %18 = vector.broadcast %17 : vector<1x256xf32> to vector<8x256xf32>
    %19 = arith.addf %16, %18 : vector<8x256xf32>
    %20 = vector.extract_strided_slice %19 {offsets = [0, 0], sizes = [8, 128], strides = [1, 1]} : vector<8x256xf32> to vector<8x128xf32>
    %21 = vector.extract_strided_slice %19 {offsets = [0, 128], sizes = [8, 128], strides = [1, 1]} : vector<8x256xf32> to vector<8x128xf32>
    %c0_17 = arith.constant 0 : index
    %c0_18 = arith.constant 0 : index
    %22 = vector.load %arg1[%c0_17, %c0_18] : memref<8x128xf32, #tpu.memory_space<vmem>>, vector<8x128xf32>
    %cst_19 = arith.constant 5.000000e-01 : f32
    %23 = vector.broadcast %cst_19 : f32 to vector<8x128xf32>
    %24 = arith.mulf %23, %21 : vector<8x128xf32>
    %25 = math.exp %24 : vector<8x128xf32>
    %26 = arith.mulf %22, %25 : vector<8x128xf32>
    %27 = arith.addf %26, %20 : vector<8x128xf32>
    %c0_20 = arith.constant 0 : index
    %c0_21 = arith.constant 0 : index
    %28 = vector.load %arg8[%c0_20, %c0_21] : memref<128x128xf32, #tpu.memory_space<vmem>>, vector<128x128xf32>
    %cst_22 = arith.constant dense<0.000000e+00> : vector<8x128xf32>
    %29 = tpu.matmul %27, %28, %cst_22 {dimension_numbers = #tpu.dot_dimension_numbers<[1], [0], [0], [1], [0, 0, 1, 1], [], []>} : vector<8x128xf32>, vector<128x128xf32>, vector<8x128xf32> -> vector<8x128xf32>
    %c0_23 = arith.constant 0 : index
    %c0_24 = arith.constant 0 : index
    %30 = vector.load %arg9[%c0_23, %c0_24] : memref<1x128xf32, #tpu.memory_space<vmem>>, vector<1x128xf32>
    %31 = vector.broadcast %30 : vector<1x128xf32> to vector<8x128xf32>
    %32 = arith.addf %29, %31 : vector<8x128xf32>
    %cst_25 = arith.constant 0.000000e+00 : f32
    %33 = vector.broadcast %cst_25 : f32 to vector<8x128xf32>
    %34 = arith.maximumf %32, %33 : vector<8x128xf32>
    %c0_26 = arith.constant 0 : index
    %c0_27 = arith.constant 0 : index
    %35 = vector.load %arg10[%c0_26, %c0_27] : memref<128x128xf32, #tpu.memory_space<vmem>>, vector<128x128xf32>
    %cst_28 = arith.constant dense<0.000000e+00> : vector<8x128xf32>
    %36 = tpu.matmul %34, %35, %cst_28 {dimension_numbers = #tpu.dot_dimension_numbers<[1], [0], [0], [1], [0, 0, 1, 1], [], []>} : vector<8x128xf32>, vector<128x128xf32>, vector<8x128xf32> -> vector<8x128xf32>
    %c0_29 = arith.constant 0 : index
    %c0_30 = arith.constant 0 : index
    %37 = vector.load %arg11[%c0_29, %c0_30] : memref<1x128xf32, #tpu.memory_space<vmem>>, vector<1x128xf32>
    %38 = vector.broadcast %37 : vector<1x128xf32> to vector<8x128xf32>
    %39 = arith.addf %36, %38 : vector<8x128xf32>
    %cst_31 = arith.constant 0.000000e+00 : f32
    %40 = vector.broadcast %cst_31 : f32 to vector<8x128xf32>
    %41 = arith.maximumf %39, %40 : vector<8x128xf32>
    %c0_32 = arith.constant 0 : index
    %c0_33 = arith.constant 0 : index
    %42 = vector.load %arg12[%c0_32, %c0_33] : memref<128x128xf32, #tpu.memory_space<vmem>>, vector<128x128xf32>
    %cst_34 = arith.constant dense<0.000000e+00> : vector<8x128xf32>
    %43 = tpu.matmul %41, %42, %cst_34 {dimension_numbers = #tpu.dot_dimension_numbers<[1], [0], [0], [1], [0, 0, 1, 1], [], []>} : vector<8x128xf32>, vector<128x128xf32>, vector<8x128xf32> -> vector<8x128xf32>
    %c0_35 = arith.constant 0 : index
    %c0_36 = arith.constant 0 : index
    %44 = vector.load %arg13[%c0_35, %c0_36] : memref<1x128xf32, #tpu.memory_space<vmem>>, vector<1x128xf32>
    %45 = vector.broadcast %44 : vector<1x128xf32> to vector<8x128xf32>
    %46 = arith.addf %43, %45 : vector<8x128xf32>
    %cst_37 = arith.constant 0.000000e+00 : f32
    %47 = vector.broadcast %cst_37 : f32 to vector<8x128xf32>
    %48 = arith.subf %47, %46 : vector<8x128xf32>
    %49 = math.exp %48 : vector<8x128xf32>
    %cst_38 = arith.constant 1.000000e+00 : f32
    %50 = vector.broadcast %cst_38 : f32 to vector<8x128xf32>
    %51 = arith.addf %50, %49 : vector<8x128xf32>
    %52 = tpu.reciprocal %51 {approx = true} : vector<8x128xf32> -> vector<8x128xf32>
    %cst_39 = arith.constant 0.000000e+00 : f32
    %cst_40 = arith.constant 1.000000e+00 : f32
    %53 = vector.broadcast %cst_39 : f32 to vector<8x128xf32>
    %54 = arith.maximumf %53, %52 : vector<8x128xf32>
    %55 = vector.broadcast %cst_40 : f32 to vector<8x128xf32>
    %56 = arith.minimumf %55, %54 : vector<8x128xf32>
    %c0_41 = arith.constant 0 : index
    %c0_42 = arith.constant 0 : index
    %57 = vector.load %arg14[%c0_41, %c0_42] : memref<8x128xf32, #tpu.memory_space<vmem>>, vector<8x128xf32>
    tpu.vector_store %arg14[%c0_41, %c0_42], %56 {strides = array<i32>} : memref<8x128xf32, #tpu.memory_space<vmem>>, vector<8x128xf32>,
    %c0_43 = arith.constant 0 : index
    %c0_44 = arith.constant 0 : index
    %58 = vector.load %arg15[%c0_43, %c0_44] : memref<8x128xf32, #tpu.memory_space<vmem>>, vector<8x128xf32>
    tpu.vector_store %arg15[%c0_43, %c0_44], %20 {strides = array<i32>} : memref<8x128xf32, #tpu.memory_space<vmem>>, vector<8x128xf32>,
    %c0_45 = arith.constant 0 : index
    %c0_46 = arith.constant 0 : index
    %59 = vector.load %arg16[%c0_45, %c0_46] : memref<8x128xf32, #tpu.memory_space<vmem>>, vector<8x128xf32>
    tpu.vector_store %arg16[%c0_45, %c0_46], %21 {strides = array<i32>} : memref<8x128xf32, #tpu.memory_space<vmem>>, vector<8x128xf32>,
    return
  }
}

</mosaic_0001>

<bundles_post_ra>
// kernel: tpu_custom_call.1
= control target key start
LH: loop header
LB: loop body
LE: loop exit
PB: predicated region body
PF: predicated region fallthrough
CT: control target
= control target key end

     0   :  { %s1827_s0 = inlined_call_operand.hbm [shape: f32[8,128], index: 0, kind: input, shape index: {}]   ;;  %s1828_s1 = inlined_call_operand.hbm [shape: f32[8,128], index: 1, kind: input, shape index: {}]   ;;  %s1829_s2 = inlined_call_operand.hbm [shape: f32[128,128], index: 2, kind: input, shape index: {}]   ;;  %s1830_s3 = inlined_call_operand.vmem [shape: f32[1,128], index: 3, kind: input, shape index: {}]   ;;  %s1831_s4 = inlined_call_operand.hbm [shape: f32[128,128], index: 4, kind: input, shape index: {}]   ;;  %s1832_s5 = inlined_call_operand.vmem [shape: f32[1,128], index: 5, kind: input, shape index: {}]   ;;  %s1833_s6 = inlined_call_operand.hbm [shape: f32[128,256], index: 6, kind: input, shape index: {}]   ;;  %s1834_s7 = inlined_call_operand.vmem [shape: f32[1,256], index: 7, kind: input, shape index: {}]   ;;  %s1835_s8 = inlined_call_operand.hbm [shape: f32[128,128], index: 8, kind: input, shape index: {}]   ;;  %s1836_s9 = inlined_call_operand.vmem [shape: f32[1,128], index: 9, kind: input, shape index: {}]   ;;  %s1837_s10 = inlined_call_operand.hbm [shape: f32[128,128], index: 10, kind: input, shape index: {}]   ;;  %s1838_s11 = inlined_call_operand.vmem [shape: f32[1,128], index: 11, kind: input, shape index: {}]   ;;  %s1839_s12 = inlined_call_operand.hbm [shape: f32[128,128], index: 12, kind: input, shape index: {}]   ;;  %s1840_s13 = inlined_call_operand.vmem [shape: f32[1,128], index: 13, kind: input, shape index: {}]   ;;  %s1841_s14 = inlined_call_operand.hbm [shape: f32[8,128], index: 14, kind: output, shape index: {0}]   ;;  %s1842_s15 = inlined_call_operand.hbm [shape: f32[8,128], index: 15, kind: output, shape index: {1}]   ;;  %s1843_s16 = inlined_call_operand.hbm [shape: f32[8,128], index: 16, kind: output, shape index: {2}]  }
   0x1   :  { %1845 = sst [smem:[#allocation27_spill]] %s1827_s0 }
   0x2   :  { %22 = vsyncpa [#allocation3], 0 }
   0x3   :  { %23 = vsyncpa [#allocation6], 0 }
   0x4   :  { %24 = vsyncpa [#allocation9], 0 }
   0x5   :  { %25 = vsyncpa [#allocation12], 0 }
   0x6   :  { %26 = vsyncpa [#allocation15], 0 }
   0x7   :  { %27 = vsyncpa [#allocation4], 0 }
   0x8   :  { %28 = vsyncpa [#allocation18], 0  ;;  %s1501_s21 = smov [#allocation5]   ;;  %s1245_s25 = scalar_lea.hbm %s1828_s1, 128 }
   0x9   :  { %s45_s22 = sshll.u32 %s1501_s21, 4  ;;  %p1246_p0 = scmp.ne.s32.totalorder %s1828_s1, %s1245_s25  ;;  %s46_s22 = int_to_ptr.vmem [resolvable:$true] %s45_s22 }
   0xa   :  { %p1249_p1 = scmp.lt.u32.totalorder %s1245_s25, %s1828_s1 }
   0xc   :  { %p1251_p2 = pnand %p1249_p1, %p1246_p0 }
   0xe   :  { %1254 = shalt.err (!%p1251_p2)
}
   0xf   :  { %s1255_s30 = scalar_lea.vmem %s46_s22, 128  ;;  %p1260_p4 = scmp.lt.s32.totalorder %s46_s22, %s46_s22 }
  0x10   :  { %p1256_p3 = scmp.ne.s32.totalorder %s46_s22, %s1255_s30  ;;  %p1261_p5 = scmp.lt.s32.totalorder %s1255_s30, %s1255_s30 }
  0x12   :  { %p1262_p6 = por %p1261_p5, %p1260_p4 }
  0x14   :  { %p1263_p7 = pnand %p1262_p6, %p1256_p3 }
  0x16   :  { %1266 = shalt.err (!%p1263_p7)
}
  0x17   :  { %48 = dma.hbm_to_vmem [thread:$0]  %s1828_s1, 128, %s46_s22, [#allocation6]  }
  0x18   :  { %s1502_s18 = smov [#allocation8]   ;;  %s1503_s20 = smov [#allocation11]  }
  0x19   :  { %s68_s19 = sshll.u32 %s1502_s18, 4  ;;  %s96_s21 = sshll.u32 %s1503_s20, 4  ;;  %s69_s19 = int_to_ptr.vmem [resolvable:$true] %s68_s19  ;;  %s97_s21 = int_to_ptr.vmem [resolvable:$true] %s96_s21 }
  0x1a   :  { %s1267_s25 = scalar_lea.hbm %s1831_s4, 2048 }
  0x1b   :  { %p1268_p8 = scmp.ne.s32.totalorder %s1831_s4, %s1267_s25  ;;  %p1271_p9 = scmp.lt.u32.totalorder %s1267_s25, %s1831_s4 }
  0x1d   :  { %p1273_p10 = pnand %p1271_p9, %p1268_p8 }
  0x1f   :  { %1276 = shalt.err (!%p1273_p10)
}
  0x20   :  { %s1277_s1 = scalar_lea.vmem %s69_s19, 2048  ;;  %p1282_p12 = scmp.lt.s32.totalorder %s69_s19, %s69_s19 }
  0x21   :  { %p1278_p11 = scmp.ne.s32.totalorder %s69_s19, %s1277_s1  ;;  %p1283_p13 = scmp.lt.s32.totalorder %s1277_s1, %s1277_s1 }
  0x23   :  { %p1284_p0 = por %p1283_p13, %p1282_p12 }
  0x25   :  { %p1285_p1 = pnand %p1284_p0, %p1278_p11 }
  0x27   :  { %1288 = shalt.err (!%p1285_p1)
}
  0x28   :  { %s1504_s22 = smov 128   ;;  %s1505_s30 = smov 8  }
  0x29   :  { %74 = dma.hbm_to_vmem [thread:$0]  %s1831_s4, 2048, %s69_s19, [#allocation9], %s1504_s22, %s1504_s22, %s1505_s30  }
  0x2a   :  { %s1289_s23 = scalar_lea.hbm %s1835_s8, 2048 }
  0x2b   :  { %p1290_p2 = scmp.ne.s32.totalorder %s1835_s8, %s1289_s23  ;;  %p1293_p3 = scmp.lt.u32.totalorder %s1289_s23, %s1835_s8 }
  0x2d   :  { %p1295_p4 = pnand %p1293_p3, %p1290_p2 }
  0x2f   :  { %1298 = shalt.err (!%p1295_p4)
}
  0x30   :  { %s1299_s28 = scalar_lea.vmem %s97_s21, 2048  ;;  %p1304_p6 = scmp.lt.s32.totalorder %s97_s21, %s97_s21 }
  0x31   :  { %p1300_p5 = scmp.ne.s32.totalorder %s97_s21, %s1299_s28  ;;  %p1305_p7 = scmp.lt.s32.totalorder %s1299_s28, %s1299_s28 }
  0x33   :  { %p1306_p8 = por %p1305_p7, %p1304_p6 }
  0x35   :  { %p1307_p9 = pnand %p1306_p8, %p1300_p5 }
  0x37   :  { %1310 = shalt.err (!%p1307_p9)
}
  0x38   :  { %102 = dma.hbm_to_vmem [thread:$0]  %s1835_s8, 2048, %s97_s21, [#allocation12], %s1504_s22, %s1504_s22, %s1505_s30  }
  0x39   :  { %s1506_s29 = smov [#allocation2]   ;;  %s1507_s0 = smov [#allocation7]  }
  0x3a   :  { %s35_s1 = sshll.u32 %s1506_s29, 4  ;;  %s54_s17 = sshll.u32 %s1507_s0, 4  ;;  %s36_s1 = int_to_ptr.vmem [resolvable:$true] %s35_s1  ;;  %s55_s17 = int_to_ptr.vmem [resolvable:$true] %s54_s17 }
  0x3b   :  { %s1846_s23 = sld [smem:[#allocation27_spill]] }
  0x41   :  { %s1311_s24 = scalar_lea.hbm %s1846_s23, 128 }
  0x42   :  { %p1312_p10 = scmp.ne.s32.totalorder %s1846_s23, %s1311_s24  ;;  %p1315_p11 = scmp.lt.u32.totalorder %s1311_s24, %s1846_s23 }
  0x44   :  { %p1317_p12 = pnand %p1315_p11, %p1312_p10 }
  0x46   :  { %1320 = shalt.err (!%p1317_p12)
}
  0x47   :  { %s1321_s8 = scalar_lea.vmem %s36_s1, 128  ;;  %p1326_p0 = scmp.lt.s32.totalorder %s36_s1, %s36_s1 }
  0x48   :  { %p1322_p13 = scmp.ne.s32.totalorder %s36_s1, %s1321_s8  ;;  %p1327_p1 = scmp.lt.s32.totalorder %s1321_s8, %s1321_s8 }
  0x4a   :  { %p1328_p2 = por %p1327_p1, %p1326_p0 }
  0x4c   :  { %p1329_p3 = pnand %p1328_p2, %p1322_p13 }
  0x4e   :  { %1332 = shalt.err (!%p1329_p3)
}
  0x4f   :  { %38 = dma.hbm_to_vmem [thread:$0]  %s1846_s23, 128, %s36_s1, [#allocation3]  }
  0x50   :  { %s1333_s0 = scalar_lea.hbm %s1829_s2, 2048 }
  0x51   :  { %p1334_p4 = scmp.ne.s32.totalorder %s1829_s2, %s1333_s0  ;;  %p1337_p5 = scmp.lt.u32.totalorder %s1333_s0, %s1829_s2 }
  0x53   :  { %p1339_p6 = pnand %p1337_p5, %p1334_p4 }
  0x55   :  { %1342 = shalt.err (!%p1339_p6)
}
  0x56   :  { %s1343_s26 = scalar_lea.vmem %s55_s17, 2048  ;;  %p1348_p8 = scmp.lt.s32.totalorder %s55_s17, %s55_s17 }
  0x57   :  { %p1344_p7 = scmp.ne.s32.totalorder %s55_s17, %s1343_s26  ;;  %p1349_p9 = scmp.lt.s32.totalorder %s1343_s26, %s1343_s26 }
  0x59   :  { %p1350_p10 = por %p1349_p9, %p1348_p8 }
  0x5b   :  { %p1351_p11 = pnand %p1350_p10, %p1344_p7 }
  0x5d   :  { %1354 = shalt.err (!%p1351_p11)
}
  0x5e   :  { %60 = dma.hbm_to_vmem [thread:$0]  %s1829_s2, 2048, %s55_s17, [#allocation6], %s1504_s22, %s1504_s22, %s1505_s30  }
  0x5f   :  { %s1508_s27 = smov [#allocation10]   ;;  %s1355_s4 = scalar_lea.hbm %s1833_s6, 4096 }
  0x60   :  { %s82_s28 = sshll.u32 %s1508_s27, 4  ;;  %p1356_p12 = scmp.ne.s32.totalorder %s1833_s6, %s1355_s4  ;;  %s83_s28 = int_to_ptr.vmem [resolvable:$true] %s82_s28 }
  0x61   :  { %p1359_p13 = scmp.lt.u32.totalorder %s1355_s4, %s1833_s6 }
  0x63   :  { %p1361_p0 = pnand %p1359_p13, %p1356_p12 }
  0x65   :  { %1364 = shalt.err (!%p1361_p0)
}
  0x66   :  { %s1365_s20 = scalar_lea.vmem %s83_s28, 4096  ;;  %p1370_p2 = scmp.lt.s32.totalorder %s83_s28, %s83_s28 }
  0x67   :  { %p1366_p1 = scmp.ne.s32.totalorder %s83_s28, %s1365_s20  ;;  %p1371_p3 = scmp.lt.s32.totalorder %s1365_s20, %s1365_s20 }
  0x69   :  { %p1372_p4 = por %p1371_p3, %p1370_p2 }
  0x6b   :  { %p1373_p5 = pnand %p1372_p4, %p1366_p1 }
  0x6d   :  { %1376 = shalt.err (!%p1373_p5)
}
  0x6e   :  { %s1509_s2 = smov 256   ;;  %s1510_s17 = smov 16  }
  0x6f   :  { %88 = dma.hbm_to_vmem [thread:$0]  %s1833_s6, 4096, %s83_s28, [#allocation9], %s1509_s2, %s1509_s2, %s1510_s17  }
  0x70   :  { %s1511_s26 = smov [#allocation13]   ;;  %s1512_s23 = smov [#allocation14]  }
  0x71   :  { %s110_s1 = sshll.u32 %s1511_s26, 4  ;;  %s124_s27 = sshll.u32 %s1512_s23, 4  ;;  %s111_s1 = int_to_ptr.vmem [resolvable:$true] %s110_s1  ;;  %s1685_s27 = int_to_ptr.vmem [resolvable:$true] %s124_s27 }
  0x72   :  { %s1377_s4 = scalar_lea.hbm %s1837_s10, 2048 }
  0x73   :  { %p1378_p6 = scmp.ne.s32.totalorder %s1837_s10, %s1377_s4  ;;  %p1381_p7 = scmp.lt.u32.totalorder %s1377_s4, %s1837_s10 }
  0x75   :  { %p1383_p8 = pnand %p1381_p7, %p1378_p6 }
  0x77   :  { %1386 = shalt.err (!%p1383_p8)
}
  0x78   :  { %s1387_s6 = scalar_lea.vmem %s111_s1, 2048  ;;  %p1392_p10 = scmp.lt.s32.totalorder %s111_s1, %s111_s1 }
  0x79   :  { %p1388_p9 = scmp.ne.s32.totalorder %s111_s1, %s1387_s6  ;;  %p1393_p11 = scmp.lt.s32.totalorder %s1387_s6, %s1387_s6 }
  0x7b   :  { %p1394_p12 = por %p1393_p11, %p1392_p10 }
  0x7d   :  { %p1395_p13 = pnand %p1394_p12, %p1388_p9 }
  0x7f   :  { %1398 = shalt.err (!%p1395_p13)
}
  0x80   :  { %116 = dma.hbm_to_vmem [thread:$0]  %s1837_s10, 2048, %s111_s1, [#allocation12], %s1504_s22, %s1504_s22, %s1505_s30  }
  0x81   :  { %s1399_s24 = scalar_lea.hbm %s1839_s12, 2048 }
  0x82   :  { %p1400_p0 = scmp.ne.s32.totalorder %s1839_s12, %s1399_s24  ;;  %p1403_p1 = scmp.lt.u32.totalorder %s1399_s24, %s1839_s12 }
  0x84   :  { %p1405_p2 = pnand %p1403_p1, %p1400_p0 }
  0x86   :  { %1408 = shalt.err (!%p1405_p2)
}
  0x87   :  { %s1409_s21 = scalar_lea.vmem %s1685_s27, 2048  ;;  %p1414_p4 = scmp.lt.s32.totalorder %s1685_s27, %s1685_s27 }
  0x88   :  { %p1410_p3 = scmp.ne.s32.totalorder %s1685_s27, %s1409_s21  ;;  %p1415_p5 = scmp.lt.s32.totalorder %s1409_s21, %s1409_s21 }
  0x8a   :  { %p1416_p6 = por %p1415_p5, %p1414_p4 }
  0x8c   :  { %p1417_p7 = pnand %p1416_p6, %p1410_p3 }
  0x8e   :  { %1420 = shalt.err (!%p1417_p7)
}
  0x8f   :  { %130 = dma.hbm_to_vmem [thread:$0]  %s1839_s12, 2048, %s1685_s27, [#allocation15], %s1504_s22, %s1504_s22, %s1505_s30  }
  0x90   :  { %1487 = dma.done.wait [#allocation3], 128  }
  0x91   :  { %1488 = vsyncadd [#allocation3], 4294967168 }
  0x92   :  { %1489 = dma.done.wait [#allocation6], 2176  }
  0x93   :  { %1490 = vsyncadd [#allocation6], 4294965120 }
  0x94   :  { %1491 = dma.done.wait [#allocation9], 6144  }
  0x95   :  { %1492 = vsyncadd [#allocation9], 4294961152 }
  0x96   :  { %1493 = dma.done.wait [#allocation12], 4096  }
  0x97   :  { %1494 = vsyncadd [#allocation12], 4294963200 }
  0x98   :  { %1495 = dma.done.wait [#allocation15], 2048  }
  0x99   :  { %1496 = vsyncadd [#allocation15], 4294965248  ;;  %v1513_v0 = vmov 0.0|0.0   ;;  %vm1514_vm0 = vmmov 0   ;;  %v1515_v1 = vmov 0.0   ;;  %v158_v2 = vld [vmem:[#allocation7] sm:$0xff] }
  0x9a   :  { %1069 = vmatprep.subr.bf16.mxu0 %v1513_v0  ;;  %926 = vmatprep.mubr.msk.f32.mxu0 %vm1514_vm0, %v1515_v1  ;;  %v159_v3 = vld [vmem:[#allocation7 + $0x8] sm:$0xff]  ;;  %v160_v4 = vld [vmem:[#allocation7 + $0x10] sm:$0xff]  ;;  %v161_v6 = vld [vmem:[#allocation7 + $0x18] sm:$0xff]  ;;  %s1516_s0 = smov [#allocation17]  }
  0x9b   :  { %1093 = vmatprep.subr.bf16.mxu1 %v1513_v0  ;;  %961 = vmatprep.mubr.msk.f32.mxu1 %vm1514_vm0, %v1515_v1  ;;  %v1070_v5 = vpack.c.bf16 %v159_v3, %v158_v2  ;;  %v1073_v7 = vpack.c.bf16 %v161_v6, %v160_v4  ;;  %v162_v8 = vld [vmem:[#allocation7 + $0x20] sm:$0xff]  ;;  %v163_v9 = vld [vmem:[#allocation7 + $0x28] sm:$0xff]  ;;  %v254_v12 = vld [vmem:[#allocation8 + $0x10] sm:$0xff] }
  0x9c   :  { %v252_v10 = vld [vmem:[#allocation8] sm:$0xff]  ;;  %v253_v11 = vld [vmem:[#allocation8 + $0x8] sm:$0xff]  ;;  %v255_v13 = vld [vmem:[#allocation8 + $0x18] sm:$0xff]  ;;  %v1076_v14 = vpack.c.bf16 %v163_v9, %v162_v8 }
  0x9d   :  { %1071 = vmatpush3.bf16.msra.mxu0 %v1070_v5  ;;  %v1094_v15 = vpack.c.bf16 %v253_v11, %v252_v10  ;;  %v164_v16 = vld [vmem:[#allocation7 + $0x30] sm:$0xff]  ;;  %v165_v17 = vld [vmem:[#allocation7 + $0x38] sm:$0xff]  ;;  %v1097_v18 = vpack.c.bf16 %v255_v13, %v254_v12  ;;  %v256_v19 = vld [vmem:[#allocation8 + $0x20] sm:$0xff] }
  0x9e   :  { %1072 = vmatprep.subr.bf16.mxu0 %v1513_v0  ;;  %v257_v20 = vld [vmem:[#allocation8 + $0x28] sm:$0xff]  ;;  %v1079_v21 = vpack.c.bf16 %v165_v17, %v164_v16  ;;  %v166_v22 = vld [vmem:[#allocation7 + $0x40] sm:$0xff]  ;;  %v258_v25 = vld [vmem:[#allocation8 + $0x30] sm:$0xff] }
  0x9f   :  { %1095 = vmatpush3.bf16.msra.mxu1 %v1094_v15  ;;  %v167_v23 = vld [vmem:[#allocation7 + $0x48] sm:$0xff]  ;;  %v1100_v24 = vpack.c.bf16 %v257_v20, %v256_v19  ;;  %v259_v26 = vld [vmem:[#allocation8 + $0x38] sm:$0xff]  ;;  %v168_v28 = vld [vmem:[#allocation7 + $0x50] sm:$0xff] }
  0xa0   :  { %1096 = vmatprep.subr.bf16.mxu1 %v1513_v0  ;;  %v1082_v27 = vpack.c.bf16 %v167_v23, %v166_v22  ;;  %v169_v29 = vld [vmem:[#allocation7 + $0x58] sm:$0xff]  ;;  %v1103_v30 = vpack.c.bf16 %v259_v26, %v258_v25  ;;  %v260_v31 = vld [vmem:[#allocation8 + $0x40] sm:$0xff]  ;;  %v261_v32 = vld [vmem:[#allocation8 + $0x48] sm:$0xff] }
  0xa1   :  { %1074 = vmatpush3.bf16.msra.mxu0 %v1073_v7  ;;  %v1085_v33 = vpack.c.bf16 %v169_v29, %v168_v28  ;;  %v170_v34 = vld [vmem:[#allocation7 + $0x60] sm:$0xff]  ;;  %v171_v35 = vld [vmem:[#allocation7 + $0x68] sm:$0xff]  ;;  %v1106_v36 = vpack.c.bf16 %v261_v32, %v260_v31  ;;  %v262_v37 = vld [vmem:[#allocation8 + $0x50] sm:$0xff] }
  0xa2   :  { %1075 = vmatprep.subr.bf16.mxu0 %v1513_v0  ;;  %v263_v38 = vld [vmem:[#allocation8 + $0x58] sm:$0xff]  ;;  %v1088_v39 = vpack.c.bf16 %v171_v35, %v170_v34  ;;  %v172_v40 = vld [vmem:[#allocation7 + $0x70] sm:$0xff]  ;;  %v264_v43 = vld [vmem:[#allocation8 + $0x60] sm:$0xff] }
  0xa3   :  { %1098 = vmatpush3.bf16.msra.mxu1 %v1097_v18  ;;  %v173_v41 = vld [vmem:[#allocation7 + $0x78] sm:$0xff]  ;;  %v1109_v42 = vpack.c.bf16 %v263_v38, %v262_v37  ;;  %v265_v44 = vld [vmem:[#allocation8 + $0x68] sm:$0xff]  ;;  %v157_v47 = vld [vmem:[#allocation2] sm:$0xff] }
  0xa4   :  { %1099 = vmatprep.subr.bf16.mxu1 %v1513_v0  ;;  %v1091_v45 = vpack.c.bf16 %v173_v41, %v172_v40  ;;  %v1112_v46 = vpack.c.bf16 %v265_v44, %v264_v43  ;;  %v266_v48 = vld [vmem:[#allocation8 + $0x70] sm:$0xff]  ;;  %v267_v49 = vld [vmem:[#allocation8 + $0x78] sm:$0xff]  ;;  %v347_v51 = vld [vmem:[#allocation10 + $0x8] sm:$0xff] }
  0xa5   :  { %1077 = vmatpush3.bf16.msra.mxu0 %v1076_v14  ;;  %v1115_v50 = vpack.c.bf16 %v267_v49, %v266_v48  ;;  %v349_v52 = vld [vmem:[#allocation10 + $0x18] sm:$0xff]  ;;  %v346_v53 = vld [vmem:[#allocation10] sm:$0xff]  ;;  %v348_v55 = vld [vmem:[#allocation10 + $0x10] sm:$0xff] }
  0xa6   :  { %1078 = vmatprep.subr.bf16.mxu0 %v1513_v0  ;;  %v1117_v54 = vpack.c.bf16 %v349_v52, %v347_v51  ;;  %v351_v56 = vld [vmem:[#allocation10 + $0x28] sm:$0xff]  ;;  %v353_v57 = vld [vmem:[#allocation10 + $0x38] sm:$0xff]  ;;  %v1119_v58 = vpack.c.bf16 %v348_v55, %v346_v53  ;;  %v350_v60 = vld [vmem:[#allocation10 + $0x20] sm:$0xff] }
  0xa7   :  { %1101 = vmatpush3.bf16.msra.mxu1 %v1100_v24  ;;  %v1121_v59 = vpack.c.bf16 %v353_v57, %v351_v56  ;;  %v352_v61 = vld [vmem:[#allocation10 + $0x30] sm:$0xff]  ;;  %v355_v62 = vld [vmem:[#allocation10 + $0x48] sm:$0xff]  ;;  %v357_v63 = vld [vmem:[#allocation10 + $0x58] sm:$0xff] }
  0xa8   :  { %1102 = vmatprep.subr.bf16.mxu1 %v1513_v0  ;;  %v1123_v2 = vpack.c.bf16 %v352_v61, %v350_v60  ;;  %v1125_v3 = vpack.c.bf16 %v357_v63, %v355_v62  ;;  %v354_v4 = vld [vmem:[#allocation10 + $0x40] sm:$0xff]  ;;  %v356_v5 = vld [vmem:[#allocation10 + $0x50] sm:$0xff]  ;;  %v359_v6 = vld [vmem:[#allocation10 + $0x68] sm:$0xff] }
  0xa9   :  { %1080 = vmatpush3.bf16.msra.mxu0 %v1079_v21  ;;  %v361_v7 = vld [vmem:[#allocation10 + $0x78] sm:$0xff]  ;;  %v1127_v8 = vpack.c.bf16 %v356_v5, %v354_v4  ;;  %v358_v10 = vld [vmem:[#allocation10 + $0x60] sm:$0xff]  ;;  %v360_v11 = vld [vmem:[#allocation10 + $0x70] sm:$0xff] }
  0xaa   :  { %1081 = vmatprep.subr.bf16.mxu0 %v1513_v0  ;;  %v1129_v9 = vpack.c.bf16 %v361_v7, %v359_v6  ;;  %v363_v12 = vld [vmem:[#allocation10 + $0x88] sm:$0xff]  ;;  %v365_v13 = vld [vmem:[#allocation10 + $0x98] sm:$0xff]  ;;  %v1131_v14 = vpack.c.bf16 %v360_v11, %v358_v10  ;;  %v362_v16 = vld [vmem:[#allocation10 + $0x80] sm:$0xff] }
  0xab   :  { %1104 = vmatpush3.bf16.msra.mxu1 %v1103_v30  ;;  %v1133_v15 = vpack.c.bf16 %v365_v13, %v363_v12  ;;  %v364_v17 = vld [vmem:[#allocation10 + $0x90] sm:$0xff]  ;;  %v367_v18 = vld [vmem:[#allocation10 + $0xa8] sm:$0xff]  ;;  %v369_v19 = vld [vmem:[#allocation10 + $0xb8] sm:$0xff] }
  0xac   :  { %1105 = vmatprep.subr.bf16.mxu1 %v1513_v0  ;;  %v1135_v20 = vpack.c.bf16 %v364_v17, %v362_v16  ;;  %v1137_v21 = vpack.c.bf16 %v369_v19, %v367_v18  ;;  %v366_v22 = vld [vmem:[#allocation10 + $0xa0] sm:$0xff]  ;;  %v368_v23 = vld [vmem:[#allocation10 + $0xb0] sm:$0xff]  ;;  %v371_v24 = vld [vmem:[#allocation10 + $0xc8] sm:$0xff] }
  0xad   :  { %1083 = vmatpush3.bf16.msra.mxu0 %v1082_v27  ;;  %v373_v25 = vld [vmem:[#allocation10 + $0xd8] sm:$0xff]  ;;  %v1139_v26 = vpack.c.bf16 %v368_v23, %v366_v22  ;;  %v370_v28 = vld [vmem:[#allocation10 + $0xc0] sm:$0xff]  ;;  %v372_v29 = vld [vmem:[#allocation10 + $0xd0] sm:$0xff] }
  0xae   :  { %1084 = vmatprep.subr.bf16.mxu0 %v1513_v0  ;;  %v1141_v27 = vpack.c.bf16 %v373_v25, %v371_v24  ;;  %v1143_v30 = vpack.c.bf16 %v372_v29, %v370_v28  ;;  %v804_v31 = vld [vmem:[%s1830_s3] ss:$0 sm:$0xff]  ;;  %v377_v37 = vld [vmem:[#allocation10 + $0xf8] sm:$0xff]  ;;  %v468_v43 = vld [vmem:[#allocation11 + $0x8] sm:$0xff] }
  0xaf   :  { %1107 = vmatpush3.bf16.msra.mxu1 %v1106_v36  ;;  %v375_v36 = vld [vmem:[#allocation10 + $0xe8] sm:$0xff]  ;;  %v376_v40 = vld [vmem:[#allocation10 + $0xf0] sm:$0xff]  ;;  %v471_v53 = vld [vmem:[#allocation11 + $0x20] sm:$0xff] }
  0xb0   :  { %1108 = vmatprep.subr.bf16.mxu1 %v1513_v0  ;;  %v1145_v38 = vpack.c.bf16 %v377_v37, %v375_v36  ;;  %v469_v44 = vld [vmem:[#allocation11 + $0x10] sm:$0xff]  ;;  %v474_v57 = vld [vmem:[#allocation11 + $0x38] sm:$0xff]  ;;  %v476_v60 = vld [vmem:[#allocation11 + $0x48] sm:$0xff] }
  0xb1   :  { %1086 = vmatpush3.bf16.msra.mxu0 %v1085_v33  ;;  %v805_v48 = vld [vmem:[%s1832_s5] ss:$0 sm:$0xff]  ;;  %v478_v63 = vld [vmem:[#allocation11 + $0x58] sm:$0xff]  ;;  %v480_v4 = vld [vmem:[#allocation11 + $0x68] sm:$0xff] }
  0xb2   :  { %1087 = vmatprep.subr.bf16.mxu0 %v1513_v0  ;;  %v473_v56 = vld [vmem:[#allocation11 + $0x30] sm:$0xff]  ;;  %v482_v7 = vld [vmem:[#allocation11 + $0x78] sm:$0xff]  ;;  %v562_v10 = vld [vmem:[#allocation13 + $0x8] sm:$0xff] }
  0xb3   :  { %1110 = vmatpush3.bf16.msra.mxu1 %v1109_v42  ;;  %v467_v42 = vld [vmem:[#allocation11] sm:$0xff]  ;;  %v477_v62 = vld [vmem:[#allocation11 + $0x50] sm:$0xff]  ;;  %v564_v13 = vld [vmem:[#allocation13 + $0x18] sm:$0xff] }
  0xb4   :  { %1111 = vmatprep.subr.bf16.mxu1 %v1513_v0  ;;  %v481_v6 = vld [vmem:[#allocation11 + $0x70] sm:$0xff]  ;;  %v566_v16 = vld [vmem:[#allocation13 + $0x28] sm:$0xff]  ;;  %v568_v19 = vld [vmem:[#allocation13 + $0x38] sm:$0xff] }
  0xb5   :  { %1089 = vmatpush3.bf16.msra.mxu0 %v1088_v39  ;;  %v374_v39 = vld [vmem:[#allocation10 + $0xe0] sm:$0xff]  ;;  %v563_v11 = vld [vmem:[#allocation13 + $0x10] sm:$0xff]  ;;  %v570_v22 = vld [vmem:[#allocation13 + $0x48] sm:$0xff] }
  0xb6   :  { %1090 = vmatprep.subr.bf16.mxu0 %v1513_v0  ;;  %v1147_v41 = vpack.c.bf16 %v376_v40, %v374_v39  ;;  %v567_v18 = vld [vmem:[#allocation13 + $0x30] sm:$0xff]  ;;  %v572_v25 = vld [vmem:[#allocation13 + $0x58] sm:$0xff]  ;;  %v574_v28 = vld [vmem:[#allocation13 + $0x68] sm:$0xff] }
  0xb7   :  { %1113 = vmatpush3.bf16.msra.mxu1 %v1112_v46  ;;  %v470_v46 = vld [vmem:[#allocation11 + $0x18] sm:$0xff]  ;;  %v571_v24 = vld [vmem:[#allocation13 + $0x50] sm:$0xff] }
  0xb8   :  { %1114 = vmatprep.subr.bf16.mxu1 %v1513_v0 }
  0xb9   :  { %1092 = vmatpush3.bf16.msra.mxu0 %v1091_v45  ;;  %v1150_v45 = vpack.c.bf16 %v468_v43, %v467_v42  ;;  %v461_v43 = vld [vmem:[#allocation5] sm:$0xff] }
  0xba   :  { %1118 = vmatprep.subr.bf16.mxu0 %v1117_v54  ;;  %v472_v54 = vld [vmem:[#allocation11 + $0x28] sm:$0xff] }
  0xbb   :  { %1116 = vmatpush3.bf16.msra.mxu1 %v1115_v50  ;;  %v1156_v55 = vpack.c.bf16 %v472_v54, %v471_v53  ;;  %v658_v54 = vld [vmem:[#allocation14 + $0x18] sm:$0xff] }
  0xbc   :  { %927 = vmatmul.mubr.f32.vlgmr.msra.gmra.mrb[0].mxu0 %v157_v47  ;;  %1149 = vmatprep.subr.bf16.mxu1 %v1513_v0  ;;  %v1153_v47 = vpack.c.bf16 %v470_v46, %v469_v44 }
  0xbd   :  { %454 = vmatprep.mubr.f32.mxu0 %v1515_v1  ;;  %1120 = vmatpush1.bf16.msra.mxu0 %v1119_v58  ;;  %v1159_v58 = vpack.c.bf16 %v474_v57, %v473_v56  ;;  %v659_v56 = vld [vmem:[#allocation14 + $0x20] sm:$0xff]  ;;  %v660_v57 = vld [vmem:[#allocation14 + $0x28] sm:$0xff] }
  0xbe   :  { %1122 = vmatprep.subr.bf16.mxu0 %v1121_v59  ;;  %v475_v59 = vld [vmem:[#allocation11 + $0x40] sm:$0xff] }
  0xbf   :  { %v1162_v61 = vpack.c.bf16 %v476_v60, %v475_v59  ;;  %v662_v59 = vld [vmem:[#allocation14 + $0x38] sm:$0xff] }
  0xc1   :  { %1124 = vmatpush1.bf16.msra.mxu0 %v1123_v2  ;;  %v1165_v2 = vpack.c.bf16 %v478_v63, %v477_v62  ;;  %v664_v62 = vld [vmem:[#allocation14 + $0x48] sm:$0xff] }
  0xc2   :  { %1126 = vmatprep.subr.bf16.mxu0 %v1125_v3  ;;  %v479_v3 = vld [vmem:[#allocation11 + $0x60] sm:$0xff] }
  0xc3   :  { %v1168_v5 = vpack.c.bf16 %v480_v4, %v479_v3  ;;  %v666_v3 = vld [vmem:[#allocation14 + $0x58] sm:$0xff] }
  0xc5   :  { %1128 = vmatpush1.bf16.msra.mxu0 %v1127_v8  ;;  %v1171_v8 = vpack.c.bf16 %v482_v7, %v481_v6  ;;  %v668_v6 = vld [vmem:[#allocation14 + $0x68] sm:$0xff] }
  0xc6   :  { %1130 = vmatprep.subr.bf16.mxu0 %v1129_v9  ;;  %v561_v9 = vld [vmem:[#allocation13] sm:$0xff] }
  0xc7   :  { %v1174_v12 = vpack.c.bf16 %v562_v10, %v561_v9 }
  0xc9   :  { %1132 = vmatpush1.bf16.msra.mxu0 %v1131_v14  ;;  %v1177_v14 = vpack.c.bf16 %v564_v13, %v563_v11  ;;  %v669_v13 = vld [vmem:[#allocation14 + $0x70] sm:$0xff] }
  0xca   :  { %1134 = vmatprep.subr.bf16.mxu0 %v1133_v15  ;;  %v565_v15 = vld [vmem:[#allocation13 + $0x20] sm:$0xff] }
  0xcb   :  { %v1180_v17 = vpack.c.bf16 %v566_v16, %v565_v15  ;;  %v807_v16 = vld [vmem:[%s1838_s11] ss:$0 sm:$0xff] }
  0xcd   :  { %1136 = vmatpush1.bf16.msra.mxu0 %v1135_v20  ;;  %v1183_v20 = vpack.c.bf16 %v568_v19, %v567_v18 }
  0xce   :  { %1138 = vmatprep.subr.bf16.mxu0 %v1137_v21  ;;  %v569_v21 = vld [vmem:[#allocation13 + $0x40] sm:$0xff] }
  0xcf   :  { %v1186_v23 = vpack.c.bf16 %v570_v22, %v569_v21 }
  0xd1   :  { %1140 = vmatpush1.bf16.msra.mxu0 %v1139_v26  ;;  %v1189_v26 = vpack.c.bf16 %v572_v25, %v571_v24 }
  0xd2   :  { %1142 = vmatprep.subr.bf16.mxu0 %v1141_v27  ;;  %v573_v27 = vld [vmem:[#allocation13 + $0x60] sm:$0xff] }
  0xd3   :  { %v1192_v29 = vpack.c.bf16 %v574_v28, %v573_v27 }
  0xd5   :  { %1144 = vmatpush1.bf16.msra.mxu0 %v1143_v30  ;;  %v380_v30 = vlaneseq }
  0xd6   :  { %1146 = vmatprep.subr.bf16.mxu0 %v1145_v38 }
  0xd9   :  { %1148 = vmatpush1.bf16.msra.mxu0 %v1147_v41 }
  0xda   :  { %1173 = vmatprep.subr.bf16.mxu0 %v1513_v0 }
 0x18f   :  { %v247_v32 = vpop.f32.mrb[0].mxu0 }
 0x190   :  { %v248_v33 = vadd.f32 %v804_v31, %v247_v32  ;;  %v928_v34 = vpop.f32.mrb[1].mxu0  ;;  %v381_v31 = vshrl.u32 %v380_v30, 7 }
 0x192   :  { %v251_v35 = vmax.f32 %v248_v33, 0.0  ;;  %v382_v32 = vsub.s32 0, %v381_v31  ;;  %v378_v33 = vld [vmem:[%s1834_s7] sm:$0x3]  ;;  %v386_v34 = vsub.s32 1, %v381_v31 }
 0x194   :  { %962 = vmatmul.mubr.f32.vlgmr.msra.gmra.mrb[0].mxu1 %v251_v35  ;;  %v383_v35 = vrot.slane %v378_v33, %v382_v32  ;;  %v387_v36 = vrot.slane %v378_v33, %v386_v34 }
 0x195   :  { %996 = vmatprep.mubr.msk.f32.mxu1 %vm1514_vm0, %v1515_v1  ;;  %1151 = vmatpush3.bf16.msra.mxu1 %v1150_v45 }
 0x196   :  { %1152 = vmatprep.subr.bf16.mxu1 %v1513_v0 }
 0x199   :  { %1154 = vmatpush3.bf16.msra.mxu1 %v1153_v47  ;;  %v575_v47 = vld [vmem:[#allocation13 + $0x70] sm:$0xff] }
 0x19a   :  { %1155 = vmatprep.subr.bf16.mxu1 %v1513_v0 }
 0x19d   :  { %1157 = vmatpush3.bf16.msra.mxu1 %v1156_v55 }
 0x19e   :  { %1158 = vmatprep.subr.bf16.mxu1 %v1513_v0 }
 0x1a1   :  { %1160 = vmatpush3.bf16.msra.mxu1 %v1159_v58  ;;  %v1204_v58 = vpack.c.bf16 %v660_v57, %v659_v56 }
 0x1a2   :  { %1161 = vmatprep.subr.bf16.mxu1 %v1513_v0 }
 0x1a5   :  { %1163 = vmatpush3.bf16.msra.mxu1 %v1162_v61  ;;  %v663_v61 = vld [vmem:[#allocation14 + $0x40] sm:$0xff] }
 0x1a6   :  { %1164 = vmatprep.subr.bf16.mxu1 %v1513_v0  ;;  %v1210_v63 = vpack.c.bf16 %v664_v62, %v663_v61 }
 0x1a9   :  { %1166 = vmatpush3.bf16.msra.mxu1 %v1165_v2  ;;  %v665_v2 = vld [vmem:[#allocation14 + $0x50] sm:$0xff] }
 0x1aa   :  { %1167 = vmatprep.subr.bf16.mxu1 %v1513_v0  ;;  %v1213_v4 = vpack.c.bf16 %v666_v3, %v665_v2 }
 0x1ad   :  { %1169 = vmatpush3.bf16.msra.mxu1 %v1168_v5  ;;  %v667_v5 = vld [vmem:[#allocation14 + $0x60] sm:$0xff] }
 0x1ae   :  { %1170 = vmatprep.subr.bf16.mxu1 %v1513_v0  ;;  %v1216_v7 = vpack.c.bf16 %v668_v6, %v667_v5 }
 0x1b1   :  { %1172 = vmatpush3.bf16.msra.mxu1 %v1171_v8  ;;  %v806_v8 = vld [vmem:[%s1836_s9] ss:$0 sm:$0xff]  ;;  %s774_s9 = sshll.u32 %s1516_s0, 4  ;;  %s775_s9 = int_to_ptr.vmem [resolvable:$true] %s774_s9 }
 0x1b2   :  { %1197 = vmatprep.subr.bf16.mxu1 %v1513_v0  ;;  %s1421_s18 = scalar_lea.vmem %s775_s9, 128  ;;  %p1426_p9 = scmp.lt.s32.totalorder %s775_s9, %s775_s9 }
 0x1b3   :  { %p1422_p8 = scmp.ne.s32.totalorder %s775_s9, %s1421_s18  ;;  %p1427_p10 = scmp.lt.s32.totalorder %s1421_s18, %s1421_s18 }
 0x1b5   :  { %p1428_p11 = por %p1427_p10, %p1426_p9 }
 0x1b7   :  { %p1429_p12 = pnand %p1428_p11, %p1422_p8 }
 0x267   :  { %v341_v49 = vpop.f32.mrb[0].mxu1 }
 0x268   :  { %v342_v50 = vadd.f32 %v805_v48, %v341_v49  ;;  %v963_v51 = vpop.f32.mrb[1].mxu1  ;;  %v576_v48 = vld [vmem:[#allocation13 + $0x78] sm:$0xff] }
 0x269   :  { %v1195_v49 = vpack.c.bf16 %v576_v48, %v575_v47  ;;  %v656_v51 = vld [vmem:[#allocation14 + $0x8] sm:$0xff] }
 0x26a   :  { %v345_v52 = vmax.f32 %v342_v50, 0.0  ;;  %v655_v50 = vld [vmem:[#allocation14] sm:$0xff] }
 0x26b   :  { %v1198_v53 = vpack.c.bf16 %v656_v51, %v655_v50 }
 0x26c   :  { %455 = vmatmul.mubr.f32.vlgmr.msra.gmra.mrb[2].mxu0 %v345_v52  ;;  %v657_v52 = vld [vmem:[#allocation14 + $0x10] sm:$0xff] }
 0x26d   :  { %1031 = vmatprep.mubr.msk.f32.mxu0 %vm1514_vm0, %v1515_v1  ;;  %1175 = vmatpush3.bf16.msra.mxu0 %v1174_v12  ;;  %v1201_v55 = vpack.c.bf16 %v658_v54, %v657_v52 }
 0x26e   :  { %1176 = vmatprep.subr.bf16.mxu0 %v1513_v0 }
 0x271   :  { %1178 = vmatpush3.bf16.msra.mxu0 %v1177_v14  ;;  %v670_v14 = vld [vmem:[#allocation14 + $0x78] sm:$0xff] }
 0x272   :  { %1179 = vmatprep.subr.bf16.mxu0 %v1513_v0  ;;  %v1219_v15 = vpack.c.bf16 %v670_v14, %v669_v13 }
 0x275   :  { %1181 = vmatpush3.bf16.msra.mxu0 %v1180_v17 }
 0x276   :  { %1182 = vmatprep.subr.bf16.mxu0 %v1513_v0 }
 0x279   :  { %1184 = vmatpush3.bf16.msra.mxu0 %v1183_v20 }
 0x27a   :  { %1185 = vmatprep.subr.bf16.mxu0 %v1513_v0 }
 0x27d   :  { %1187 = vmatpush3.bf16.msra.mxu0 %v1186_v23 }
 0x27e   :  { %1188 = vmatprep.subr.bf16.mxu0 %v1513_v0 }
 0x281   :  { %1190 = vmatpush3.bf16.msra.mxu0 %v1189_v26 }
 0x282   :  { %1191 = vmatprep.subr.bf16.mxu0 %v1513_v0 }
 0x285   :  { %1193 = vmatpush3.bf16.msra.mxu0 %v1192_v29 }
 0x286   :  { %1194 = vmatprep.subr.bf16.mxu0 %v1513_v0 }
 0x289   :  { %1196 = vmatpush3.bf16.msra.mxu0 %v1195_v49 }
 0x33f   :  { %v456_v37 = vpop.f32.mrb[2].mxu0 }
 0x340   :  { %v457_v38 = vadd.f32 %v456_v37, %v383_v35  ;;  %v458_v39 = vpop.f32.mrb[3].mxu0 }
 0x341   :  { %v459_v40 = vadd.f32 %v458_v39, %v387_v36 }
 0x342   :  { %756 = vst [vmem:[#allocation17] sm:$0xff] %v457_v38 }
 0x343   :  { %v462_v41 = vmul.f32 0.5, %v459_v40  ;;  %757 = vst [vmem:[#allocation19] sm:$0xff] %v459_v40 }
 0x345   :  { %v463_v42 = vmul.f32 1.442695, %v462_v41 }
 0x347   :  { %1239 = vpow2.f32 %v463_v42 }
 0x351   :  { %v1240_v44 = vpop.eup %1239 }
 0x352   :  { %v465_v45 = vmul.f32 %v1240_v44, %v461_v43 }
 0x354   :  { %v466_v46 = vadd.f32 %v465_v45, %v457_v38 }
 0x356   :  { %997 = vmatmul.mubr.f32.vlgmr.msra.gmra.mrb[2].mxu1 %v466_v46 }
 0x357   :  { %1066 = vmatprep.mubr.msk.f32.mxu1 %vm1514_vm0, %v1515_v1  ;;  %1199 = vmatpush3.bf16.msra.mxu1 %v1198_v53  ;;  %v661_v1 = vld [vmem:[#allocation14 + $0x30] sm:$0xff] }
 0x358   :  { %1200 = vmatprep.subr.bf16.mxu1 %v1513_v0  ;;  %v1207_v60 = vpack.c.bf16 %v662_v59, %v661_v1 }
 0x35b   :  { %1202 = vmatpush3.bf16.msra.mxu1 %v1201_v55 }
 0x35c   :  { %1203 = vmatprep.subr.bf16.mxu1 %v1513_v0 }
 0x35f   :  { %1205 = vmatpush3.bf16.msra.mxu1 %v1204_v58 }
 0x360   :  { %1206 = vmatprep.subr.bf16.mxu1 %v1513_v0 }
 0x363   :  { %1208 = vmatpush3.bf16.msra.mxu1 %v1207_v60 }
 0x364   :  { %1209 = vmatprep.subr.bf16.mxu1 %v1513_v0 }
 0x367   :  { %1211 = vmatpush3.bf16.msra.mxu1 %v1210_v63 }
 0x368   :  { %1212 = vmatprep.subr.bf16.mxu1 %v1513_v0 }
 0x36b   :  { %1214 = vmatpush3.bf16.msra.mxu1 %v1213_v4 }
 0x36c   :  { %1215 = vmatprep.subr.bf16.mxu1 %v1513_v0 }
 0x36f   :  { %1217 = vmatpush3.bf16.msra.mxu1 %v1216_v7 }
 0x370   :  { %1218 = vmatprep.subr.bf16.mxu1 %v1513_v0 }
 0x373   :  { %1220 = vmatpush3.bf16.msra.mxu1 %v1219_v15 }
 0x429   :  { %v556_v9 = vpop.f32.mrb[2].mxu1 }
 0x42a   :  { %v557_v10 = vadd.f32 %v806_v8, %v556_v9  ;;  %v998_v11 = vpop.f32.mrb[3].mxu1 }
 0x42c   :  { %v560_v12 = vmax.f32 %v557_v10, 0.0 }
 0x42e   :  { %1032 = vmatmul.mubr.f32.vlgmr.msra.gmra.mrb[4].mxu0 %v560_v12 }
 0x501   :  { %v650_v17 = vpop.f32.mrb[4].mxu0 }
 0x502   :  { %v651_v18 = vadd.f32 %v807_v16, %v650_v17  ;;  %v1033_v0 = vpop.f32.mrb[5].mxu0 }
 0x504   :  { %v654_v19 = vmax.f32 %v651_v18, 0.0 }
 0x506   :  { %1067 = vmatmul.mubr.f32.vlgmr.msra.gmra.mrb[4].mxu1 %v654_v19 }
 0x507   :  { %1432 = shalt.err (!%p1429_p12)
}
 0x508   :  { %s1433_s20 = scalar_lea.hbm %s1842_s15, 128 }
 0x509   :  { %p1434_p13 = scmp.ne.s32.totalorder %s1842_s15, %s1433_s20  ;;  %p1437_p0 = scmp.lt.u32.totalorder %s1433_s20, %s1842_s15 }
 0x50b   :  { %p1439_p1 = pnand %p1437_p0, %p1434_p13 }
 0x50d   :  { %1442 = shalt.err (!%p1439_p1)
}
 0x50e   :  { %777 = dma.vmem_to_hbm [thread:$0]  %s775_s9, 128, %s1842_s15, [#allocation18]  }
 0x50f   :  { %s1517_s23 = smov [#allocation19]  }
 0x510   :  { %s784_s8 = sshll.u32 %s1517_s23, 4  ;;  %s785_s8 = int_to_ptr.vmem [resolvable:$true] %s784_s8 }
 0x511   :  { %s1443_s21 = scalar_lea.vmem %s785_s8, 128  ;;  %p1448_p3 = scmp.lt.s32.totalorder %s785_s8, %s785_s8 }
 0x512   :  { %p1444_p2 = scmp.ne.s32.totalorder %s785_s8, %s1443_s21  ;;  %p1449_p4 = scmp.lt.s32.totalorder %s1443_s21, %s1443_s21 }
 0x514   :  { %p1450_p5 = por %p1449_p4, %p1448_p3 }
 0x516   :  { %p1451_p6 = pnand %p1450_p5, %p1444_p2 }
 0x518   :  { %1454 = shalt.err (!%p1451_p6)
}
 0x519   :  { %s1455_s12 = scalar_lea.hbm %s1843_s16, 128 }
 0x51a   :  { %p1456_p7 = scmp.ne.s32.totalorder %s1843_s16, %s1455_s12  ;;  %p1459_p8 = scmp.lt.u32.totalorder %s1455_s12, %s1843_s16 }
 0x51c   :  { %p1461_p9 = pnand %p1459_p8, %p1456_p7 }
 0x51e   :  { %1464 = shalt.err (!%p1461_p9)
}
 0x51f   :  { %787 = dma.vmem_to_hbm [thread:$0]  %s785_s8, 128, %s1843_s16, [#allocation18]   ;;  %v808_v20 = vld [vmem:[%s1840_s13] ss:$0 sm:$0xff] }
 0x520   :  { %s1518_s19 = smov [#allocation16]  }
 0x521   :  { %s764_s29 = sshll.u32 %s1518_s19, 4  ;;  %s765_s29 = int_to_ptr.vmem [resolvable:$true] %s764_s29 }
 0x522   :  { %s1465_s16 = scalar_lea.vmem %s765_s29, 128  ;;  %p1470_p11 = scmp.lt.s32.totalorder %s765_s29, %s765_s29 }
 0x523   :  { %p1466_p10 = scmp.ne.s32.totalorder %s765_s29, %s1465_s16  ;;  %p1471_p12 = scmp.lt.s32.totalorder %s1465_s16, %s1465_s16 }
 0x525   :  { %p1472_p13 = por %p1471_p12, %p1470_p11 }
 0x527   :  { %p1473_p0 = pnand %p1472_p13, %p1466_p10 }
 0x5d9   :  { %v744_v21 = vpop.f32.mrb[4].mxu1 }
 0x5da   :  { %v745_v22 = vadd.f32 %v808_v20, %v744_v21  ;;  %v1068_v23 = vpop.f32.mrb[5].mxu1 }
 0x5dc   :  { %v748_v24 = vsub.f32 0.0, %v745_v22 }
 0x5de   :  { %v749_v25 = vmul.f32 1.442695, %v748_v24 }
 0x5e0   :  { %1241 = vpow2.f32 %v749_v25 }
 0x5ea   :  { %v1242_v26 = vpop.eup %1241 }
 0x5eb   :  { %v751_v27 = vadd.f32 1.0, %v1242_v26 }
 0x5ed   :  { %1243 = vrcp.f32 %v751_v27 }
 0x5f7   :  { %v1244_v28 = vpop.eup %1243 }
 0x5f8   :  { %v753_v29 = vmax.f32 %v1244_v28, 0.0 }
 0x5fa   :  { %v754_v30 = vmin.f32 %v753_v29, 1.0 }
 0x5fc   :  { %755 = vst [vmem:[#allocation16] sm:$0xff] %v754_v30 }
 0x5fd   :  { %1476 = shalt.err (!%p1473_p0)
}
 0x5fe   :  { %s1477_s9 = scalar_lea.hbm %s1841_s14, 128 }
 0x5ff   :  { %p1478_p1 = scmp.ne.s32.totalorder %s1841_s14, %s1477_s9  ;;  %p1481_p2 = scmp.lt.u32.totalorder %s1477_s9, %s1841_s14 }
 0x601   :  { %p1483_p3 = pnand %p1481_p2, %p1478_p1 }
 0x603   :  { %1486 = shalt.err (!%p1483_p3)
}
 0x604   :  { %767 = dma.vmem_to_hbm [thread:$0]  %s765_s29, 128, %s1841_s14, [#allocation4]  }
 0x605   :  { %1497 = dma.done.wait [#allocation4], 128  }
 0x606   :  { %1498 = vsyncadd [#allocation4], 4294967168 }
 0x607   :  { %1499 = dma.done.wait [#allocation18], 256  }
 0x608   :  { %1500 = vsyncadd [#allocation18], 4294967040 }
 0x609   :  { %797 = vsyncpa [#allocation3], 1 }
 0x60a   :  { %798 = vsyncpa [#allocation6], 1 }
 0x60b   :  { %799 = vsyncpa [#allocation9], 1 }
 0x60c   :  { %800 = vsyncpa [#allocation12], 1 }
 0x60d   :  { %801 = vsyncpa [#allocation15], 1 }
 0x60e   :  { %802 = vsyncpa [#allocation4], 1 }
 0x60f   :  { %803 = vsyncpa [#allocation18], 1 }

</bundles_post_ra>
